<compile_context>
chip_gen: v7x
topology: tpu7x:2x2x1
jax: 0.10.0
libtpu: 0.0.40
codegen_flags: <defaults>
</compile_context>

<pallas_src>
import functools

import jax
import jax.numpy as jnp
from jax.experimental import pallas as pl
from jax.experimental.pallas import tpu as pltpu

LAMDA_PSEUDO = 0.5


def _round_up(x, m):
    return (x + m - 1) // m * m


def _uncertainty_loss_kernel(g_ref, e_ref, out_ref, acc_ref, *,
                             n_rows, n_samples, lamda, needs_mask):
    pid = pl.program_id(0)
    last = pl.num_programs(0) - 1

    @pl.when(pid == 0)
    def _init():
        acc_ref[0] = jnp.float32(0.0)   # sum over rows of std
        acc_ref[1] = jnp.float32(0.0)   # sum over rows of sum_n|g - mean_e| / std

    g = g_ref[...].astype(jnp.float32)   # (tile_r, N)
    e = e_ref[...].astype(jnp.float32)   # (tile_r, N)
    tile_r = g.shape[0]

    # Unbiased variance / std of `gaze` along N (matches torch.std default).
    mean_g = jnp.mean(g, axis=-1, keepdims=True)                         # (tile_r, 1)
    var = jnp.sum((g - mean_g) ** 2, axis=-1, keepdims=True) / (n_samples - 1)
    inv_std = jax.lax.rsqrt(var)                                         # (tile_r, 1)
    std = var * inv_std                                                  # == sqrt(var)

    # Pseudo-label term with the divide hoisted out of the N-element path.
    mean_e = jnp.mean(e, axis=-1, keepdims=True)                         # (tile_r, 1)
    absdiff_rowsum = jnp.sum(jnp.abs(g - mean_e), axis=-1, keepdims=True)
    pseudo_rows = absdiff_rowsum * inv_std                               # (tile_r, 1)

    if needs_mask:
        # Rows beyond n_rows are zero-padding added by the wrapper; their
        # std/pseudo values are nan (0 * inf) and must be masked out.
        row_ids = pid * tile_r + jax.lax.broadcasted_iota(jnp.int32, (tile_r, 1), 0)
        valid = row_ids < n_rows
        std = jnp.where(valid, std, 0.0)
        pseudo_rows = jnp.where(valid, pseudo_rows, 0.0)

    acc_ref[0] += jnp.sum(std)
    acc_ref[1] += jnp.sum(pseudo_rows)

    @pl.when(pid == last)
    def _finalize():
        term_std = acc_ref[0] / jnp.float32(n_rows)
        term_pseudo = acc_ref[1] / jnp.float32(n_rows * n_samples)
        # TODO(synk): std.detach() only affects gradients (stop-grad through
        # std in the pseudo term); forward value is identical. A custom VJP
        # would be needed to reproduce that backward behaviour.
        out_ref[0] = term_std + lamda * term_pseudo


def uncertainty_w_pseudo_label_loss(gaze, gaze_ema, *,
                                    lamda_pseudo=LAMDA_PSEUDO, tile_rows=512):
    assert gaze.shape == gaze_ema.shape
    B, C, N = gaze.shape
    assert C == 2, "gaze is expected to have 2 angle channels"
    assert N >= 2, "unbiased std needs at least 2 samples"

    R = B * C
    g = gaze.reshape(R, N)       # free, contiguous reshape
    e = gaze_ema.reshape(R, N)

    # Row tile: multiple of 8 sublanes, capped at tile_rows; single tile when
    # the whole row axis fits.
    tile_r = min(_round_up(tile_rows, 8), _round_up(R, 8))
    r_pad = _round_up(R, tile_r)
    if r_pad != R:
        g = jnp.pad(g, ((0, r_pad - R), (0, 0)))
        e = jnp.pad(e, ((0, r_pad - R), (0, 0)))
    num_tiles = r_pad // tile_r

    kernel = functools.partial(
        _uncertainty_loss_kernel,
        n_rows=R, n_samples=N, lamda=lamda_pseudo,
        needs_mask=(r_pad != R))

    out = pl.pallas_call(
        kernel,
        out_shape=jax.ShapeDtypeStruct((1,), jnp.float32),
        grid_spec=pltpu.PrefetchScalarGridSpec(
            num_scalar_prefetch=0,
            grid=(num_tiles,),
            in_specs=[
                pl.BlockSpec((tile_r, N), lambda i: (i, 0)),
                pl.BlockSpec((tile_r, N), lambda i: (i, 0)),
            ],
            # Scalar result goes straight through SMEM (no padded VMEM tile).
            out_specs=pl.BlockSpec(memory_space=pltpu.MemorySpace.SMEM),
            scratch_shapes=[pltpu.SMEM((2,), jnp.float32)],
        ),
        compiler_params=pltpu.CompilerParams(
            # Serial accumulation over the row-tile axis.
            dimension_semantics=("arbitrary",),
        ),
    )(g, e)
    return out[0]


def _reference_loss(gaze, gaze_ema, lamda_pseudo=LAMDA_PSEUDO):
    # Pure-JAX reference mirroring the PyTorch module.
    std = jnp.std(gaze, axis=2, ddof=1).reshape(-1, 2, 1)
    mean = jnp.mean(gaze_ema, axis=2).reshape(-1, 2, 1)
    return jnp.mean(std) + lamda_pseudo * jnp.mean(jnp.abs(gaze - mean) / std)


if __name__ == "__main__":
    key = jax.random.PRNGKey(0)
    k1, k2, k3, k4 = jax.random.split(key, 4)

    # Small shape consistent with the module: (batch, 2 gaze angles, n samples).
    B, C, N = 4, 2, 16
    gaze = jax.random.normal(k1, (B, C, N), dtype=jnp.float32)
    gaze_ema = gaze + 0.05 * jax.random.normal(k2, (B, C, N), dtype=jnp.float32)

    loss = jax.block_until_ready(uncertainty_w_pseudo_label_loss(gaze, gaze_ema))
    ref = _reference_loss(gaze, gaze_ema)
    assert jnp.allclose(loss, ref, rtol=1e-5, atol=1e-5), (loss, ref)

    # Second case exercising the multi-tile grid + row masking (row count not
    # a multiple of the tile size).
    B2, N2 = 70, 32
    gaze2 = jax.random.normal(k3, (B2, C, N2), dtype=jnp.float32)
    gaze2_ema = gaze2 + 0.05 * jax.random.normal(k4, (B2, C, N2), dtype=jnp.float32)
    loss2 = jax.block_until_ready(
        uncertainty_w_pseudo_label_loss(gaze2, gaze2_ema, tile_rows=64))
    ref2 = _reference_loss(gaze2, gaze2_ema)
    assert jnp.allclose(loss2, ref2, rtol=1e-5, atol=1e-5), (loss2, ref2)

    print("KERNEL_OK")
</pallas_src>

<mosaic_0001>
module attributes {stable_mosaic.version = 11 : i64} {
  func.func @_uncertainty_loss_kernel(%arg0: i32, %arg1: memref<8x16xf32, #tpu.memory_space<vmem>>, %arg2: memref<8x16xf32, #tpu.memory_space<vmem>>, %arg3: memref<1xf32, #tpu.memory_space<smem>>, %arg4: memref<2xf32, #tpu.memory_space<smem>>) attributes {dimension_semantics = [#tpu.dimension_semantics<arbitrary>], iteration_bounds = array<i64: 1>, scalar_prefetch = 0 : i64, scratch_operands = 1 : i64, tpu.core_type = #tpu.core_type<tc>, window_params = [{transform_indices = @transform_0, window_bounds = array<i64: 8, 16>}, {transform_indices = @transform_1, window_bounds = array<i64: 8, 16>}, {transform_indices = @transform_2, window_bounds = array<i64: 1>}]} {
    %c0_i32 = arith.constant 0 : i32
    %0 = arith.cmpi eq, %arg0, %c0_i32 : i32
    %1 = arith.extui %0 : i1 to i32
    %c0_i32_0 = arith.constant 0 : i32
    %2 = arith.cmpi ne, %1, %c0_i32_0 : i32
    scf.if %2 {
      %cst_17 = arith.constant 0.000000e+00 : f32
      %c0_18 = arith.constant 0 : index
      %45 = memref.load %arg4[%c0_18] : memref<2xf32, #tpu.memory_space<smem>>
      memref.store %cst_17, %arg4[%c0_18] : memref<2xf32, #tpu.memory_space<smem>>
      %cst_19 = arith.constant 0.000000e+00 : f32
      %c1_20 = arith.constant 1 : index
      %46 = memref.load %arg4[%c1_20] : memref<2xf32, #tpu.memory_space<smem>>
      memref.store %cst_19, %arg4[%c1_20] : memref<2xf32, #tpu.memory_space<smem>>
    } else {
    }
    %c0 = arith.constant 0 : index
    %c0_1 = arith.constant 0 : index
    %3 = vector.load %arg1[%c0, %c0_1] : memref<8x16xf32, #tpu.memory_space<vmem>>, vector<8x16xf32>
    %c0_2 = arith.constant 0 : index
    %c0_3 = arith.constant 0 : index
    %4 = vector.load %arg2[%c0_2, %c0_3] : memref<8x16xf32, #tpu.memory_space<vmem>>, vector<8x16xf32>
    %cst = arith.constant dense<0.000000e+00> : vector<8xf32>
    %5 = vector.multi_reduction <add>, %3, %cst [1] : vector<8x16xf32> to vector<8xf32>
    %6 = vector.shape_cast %5 : vector<8xf32> to vector<8x1xf32>
    %cst_4 = arith.constant 1.600000e+01 : f32
    %7 = vector.broadcast %cst_4 : f32 to vector<8x1xf32>
    %8 = arith.divf %6, %7 : vector<8x1xf32>
    %9 = vector.broadcast %8 : vector<8x1xf32> to vector<8x16xf32>
    %10 = arith.subf %3, %9 : vector<8x16xf32>
    %11 = arith.mulf %10, %10 : vector<8x16xf32>
    %cst_5 = arith.constant dense<0.000000e+00> : vector<8xf32>
    %12 = vector.multi_reduction <add>, %11, %cst_5 [1] : vector<8x16xf32> to vector<8xf32>
    %13 = vector.shape_cast %12 : vector<8xf32> to vector<8x1xf32>
    %cst_6 = arith.constant 1.500000e+01 : f32
    %14 = vector.broadcast %cst_6 : f32 to vector<8x1xf32>
    %15 = arith.divf %13, %14 : vector<8x1xf32>
    %16 = math.rsqrt %15 : vector<8x1xf32>
    %17 = arith.mulf %15, %16 : vector<8x1xf32>
    %cst_7 = arith.constant dense<0.000000e+00> : vector<8xf32>
    %18 = vector.multi_reduction <add>, %4, %cst_7 [1] : vector<8x16xf32> to vector<8xf32>
    %19 = vector.shape_cast %18 : vector<8xf32> to vector<8x1xf32>
    %cst_8 = arith.constant 1.600000e+01 : f32
    %20 = vector.broadcast %cst_8 : f32 to vector<8x1xf32>
    %21 = arith.divf %19, %20 : vector<8x1xf32>
    %22 = vector.broadcast %21 : vector<8x1xf32> to vector<8x16xf32>
    %23 = arith.subf %3, %22 : vector<8x16xf32>
    %24 = math.absf %23 : vector<8x16xf32>
    %cst_9 = arith.constant dense<0.000000e+00> : vector<8xf32>
    %25 = vector.multi_reduction <add>, %24, %cst_9 [1] : vector<8x16xf32> to vector<8xf32>
    %26 = vector.shape_cast %25 : vector<8xf32> to vector<8x1xf32>
    %27 = arith.mulf %26, %16 : vector<8x1xf32>
    %c0_10 = arith.constant 0 : index
    %28 = memref.load %arg4[%c0_10] : memref<2xf32, #tpu.memory_space<smem>>
    %29 = vector.shape_cast %17 : vector<8x1xf32> to vector<1x8x1xf32>
    %cst_11 = arith.constant dense<0.000000e+00> : vector<1xf32>
    %30 = vector.multi_reduction <add>, %29, %cst_11 [1, 2] : vector<1x8x1xf32> to vector<1xf32>
    %31 = vector.shape_cast %30 : vector<1xf32> to vector<1x1x1xf32>
    %32 = vector.extract %31[0, 0, 0] : f32 from vector<1x1x1xf32>
    %33 = arith.addf %28, %32 : f32
    %c0_12 = arith.constant 0 : index
    %34 = memref.load %arg4[%c0_12] : memref<2xf32, #tpu.memory_space<smem>>
    memref.store %33, %arg4[%c0_12] : memref<2xf32, #tpu.memory_space<smem>>
    %c1 = arith.constant 1 : index
    %35 = memref.load %arg4[%c1] : memref<2xf32, #tpu.memory_space<smem>>
    %36 = vector.shape_cast %27 : vector<8x1xf32> to vector<1x8x1xf32>
    %cst_13 = arith.constant dense<0.000000e+00> : vector<1xf32>
    %37 = vector.multi_reduction <add>, %36, %cst_13 [1, 2] : vector<1x8x1xf32> to vector<1xf32>
    %38 = vector.shape_cast %37 : vector<1xf32> to vector<1x1x1xf32>
    %39 = vector.extract %38[0, 0, 0] : f32 from vector<1x1x1xf32>
    %40 = arith.addf %35, %39 : f32
    %c1_14 = arith.constant 1 : index
    %41 = memref.load %arg4[%c1_14] : memref<2xf32, #tpu.memory_space<smem>>
    memref.store %40, %arg4[%c1_14] : memref<2xf32, #tpu.memory_space<smem>>
    %c0_i32_15 = arith.constant 0 : i32
    %42 = arith.cmpi eq, %arg0, %c0_i32_15 : i32
    %43 = arith.extui %42 : i1 to i32
    %c0_i32_16 = arith.constant 0 : i32
    %44 = arith.cmpi ne, %43, %c0_i32_16 : i32
    scf.if %44 {
      %c0_17 = arith.constant 0 : index
      %45 = memref.load %arg4[%c0_17] : memref<2xf32, #tpu.memory_space<smem>>
      %cst_18 = arith.constant 8.000000e+00 : f32
      %46 = arith.divf %45, %cst_18 : f32
      %c1_19 = arith.constant 1 : index
      %47 = memref.load %arg4[%c1_19] : memref<2xf32, #tpu.memory_space<smem>>
      %cst_20 = arith.constant 1.280000e+02 : f32
      %48 = arith.divf %47, %cst_20 : f32
      %cst_21 = arith.constant 5.000000e-01 : f32
      %49 = arith.mulf %cst_21, %48 : f32
      %50 = arith.addf %46, %49 : f32
      %c0_22 = arith.constant 0 : index
      %51 = memref.load %arg3[%c0_22] : memref<1xf32, #tpu.memory_space<smem>>
      memref.store %50, %arg3[%c0_22] : memref<1xf32, #tpu.memory_space<smem>>
    } else {
    }
    return
  }
  func.func @transform_0(%arg0: i32) -> (i32, i32) {
    %c0_i32 = arith.constant 0 : i32
    %c0_i32_0 = arith.constant 0 : i32
    return %arg0, %c0_i32 : i32, i32
  }
  func.func @transform_1(%arg0: i32) -> (i32, i32) {
    %c0_i32 = arith.constant 0 : i32
    %c0_i32_0 = arith.constant 0 : i32
    return %arg0, %c0_i32 : i32, i32
  }
  func.func @transform_2(%arg0: i32) -> i32 {
    %c0_i32 = arith.constant 0 : i32
    %c0_i32_0 = arith.constant 0 : i32
    return %c0_i32 : i32
  }
}

</mosaic_0001>

<bundles_post_ra>
// kernel: tpu_custom_call.1
= control target key start
LH: loop header
LB: loop body
LE: loop exit
PB: predicated region body
PF: predicated region fallthrough
CT: control target
= control target key end

     0   :  { %7 = vsyncpa [#allocation4], 0  ;;  %s259_s0 = inlined_call_operand.hbm [shape: f32[8,16], index: 0, kind: input, shape index: {}]   ;;  %s260_s1 = inlined_call_operand.hbm [shape: f32[8,16], index: 1, kind: input, shape index: {}]   ;;  %s261_s2 = inlined_call_operand.hbm [shape: f32[1], index: 2, kind: output, shape index: {}]  }
   0x1   :  { %8 = vsyncpa [#allocation7], 0 }
   0x2   :  { %9 = vsyncpa [#allocation5], 0  ;;  %s201_s9 = smov [#allocation3]   ;;  %s202_s11 = smov [#allocation6]  }
   0x3   :  { %s16_s10 = sshll.u32 %s201_s9, 4  ;;  %s26_s12 = sshll.u32 %s202_s11, 4  ;;  %s17_s10 = int_to_ptr.vmem [resolvable:$true] %s16_s10  ;;  %s27_s12 = int_to_ptr.vmem [resolvable:$true] %s26_s12 }
   0x4   :  { %s141_s15 = scalar_lea.hbm %s259_s0, 128 }
   0x5   :  { %p142_p0 = scmp.ne.s32.totalorder %s259_s0, %s141_s15  ;;  %p145_p1 = scmp.lt.u32.totalorder %s141_s15, %s259_s0 }
   0x7   :  { %p147_p2 = pnand %p145_p1, %p142_p0 }
   0x9   :  { %150 = shalt.err (!%p147_p2)
}
   0xa   :  { %s151_s20 = scalar_lea.vmem %s17_s10, 128  ;;  %p156_p4 = scmp.lt.s32.totalorder %s17_s10, %s17_s10 }
   0xb   :  { %p152_p3 = scmp.ne.s32.totalorder %s17_s10, %s151_s20  ;;  %p157_p5 = scmp.lt.s32.totalorder %s151_s20, %s151_s20 }
   0xd   :  { %p158_p6 = por %p157_p5, %p156_p4 }
   0xf   :  { %p159_p7 = pnand %p158_p6, %p152_p3 }
  0x11   :  { %162 = shalt.err (!%p159_p7)
}
  0x12   :  { %19 = dma.hbm_to_vmem [thread:$0]  %s259_s0, 128, %s17_s10, [#allocation4]  }
  0x13   :  { %s163_s25 = scalar_lea.hbm %s260_s1, 128 }
  0x14   :  { %p164_p8 = scmp.ne.s32.totalorder %s260_s1, %s163_s25  ;;  %p167_p9 = scmp.lt.u32.totalorder %s163_s25, %s260_s1 }
  0x16   :  { %p169_p10 = pnand %p167_p9, %p164_p8 }
  0x18   :  { %172 = shalt.err (!%p169_p10)
}
  0x19   :  { %s173_s30 = scalar_lea.vmem %s27_s12, 128  ;;  %p178_p12 = scmp.lt.s32.totalorder %s27_s12, %s27_s12 }
  0x1a   :  { %p174_p11 = scmp.ne.s32.totalorder %s27_s12, %s173_s30  ;;  %p179_p13 = scmp.lt.s32.totalorder %s173_s30, %s173_s30 }
  0x1c   :  { %p180_p0 = por %p179_p13, %p178_p12 }
  0x1e   :  { %p181_p1 = pnand %p180_p0, %p174_p11 }
  0x20   :  { %184 = shalt.err (!%p181_p1)
}
  0x21   :  { %29 = dma.hbm_to_vmem [thread:$0]  %s260_s1, 128, %s27_s12, [#allocation7]  }
  0x22   :  { %195 = dma.done.wait [#allocation4], 128  }
  0x23   :  { %196 = vsyncadd [#allocation4], 4294967168 }
  0x24   :  { %197 = dma.done.wait [#allocation7], 128  }
  0x25   :  { %198 = vsyncadd [#allocation7], 4294967168  ;;  %vm46_vm0 = vcmask 130048   ;;  %v44_v0 = vld [vmem:[#allocation3] sm:$0xff]  ;;  %v45_v1 = vld [vmem:[#allocation6] sm:$0xff]  ;;  %vm72_vm1 = vcmask 7168  }
  0x26   :  { %v47_v2 = vsel %vm46_vm0, %v44_v0, 0.0  ;;  %v61_v3 = vsel %vm46_vm0, %v45_v1, 0.0  ;;  %s185_s11 = scalar_lea.hbm %s261_s2, 16 }
  0x27   :  { %48 = vadd.xlane.f32.xlu0 %v47_v2  ;;  %p186_p2 = scmp.ne.s32.totalorder %s261_s2, %s185_s11  ;;  %p189_p3 = scmp.lt.u32.totalorder %s185_s11, %s261_s2 }
  0x29   :  { %p191_p4 = pnand %p189_p3, %p186_p2 }
  0x2b   :  { %62 = vadd.xlane.f32.xlu0 %v61_v3 }
  0xb4   :  { %v49_v4 = vpop.xlane.xlu0 %48 }
  0xb5   :  { %v51_v5 = vmul.f32 0.0625, %v49_v4 }
  0xb7   :  { %v52_v6 = vsub.f32 %v44_v0, %v51_v5 }
  0xb8   :  { %v63_v7 = vpop.xlane.xlu0 %62 }
  0xb9   :  { %v53_v8 = vmul.f32 %v52_v6, %v52_v6  ;;  %v64_v9 = vmul.f32 0.0625, %v63_v7 }
  0xbb   :  { %v54_v10 = vsel %vm46_vm0, %v53_v8, 0.0  ;;  %v65_v11 = vsub.f32 %v44_v0, %v64_v9 }
  0xbc   :  { %55 = vadd.xlane.f32.xlu1 %v54_v10 }
  0xbd   :  { %v66_v12 = vand.u32 2147483647, %v65_v11 }
  0xbf   :  { %v67_v13 = vsel %vm46_vm0, %v66_v12, 0.0 }
  0xc0   :  { %68 = vadd.xlane.f32.xlu1 %v67_v13 }
 0x149   :  { %v56_v14 = vpop.xlane.xlu1 %55 }
 0x14a   :  { %v58_v15 = vmul.f32 0.06666667, %v56_v14 }
 0x14c   :  { %139 = vrsqrt.f32 %v58_v15 }
 0x14d   :  { %v69_v16 = vpop.xlane.xlu1 %68 }
 0x156   :  { %v140_v17 = vpop.eup %139 }
 0x157   :  { %v70_v18 = vmul.f32 %v140_v17, %v69_v16  ;;  %v60_v19 = vmul.f32 %v140_v17, %v58_v15 }
 0x159   :  { %v73_v20 = vsel %vm72_vm1, %v60_v19, 0.0  ;;  %v87_v21 = vsel %vm72_vm1, %v70_v18, 0.0 }
 0x15a   :  { %74 = vadd.xlane.f32.xlu0 %v73_v20  ;;  %88 = vadd.xlane.f32.xlu1 %v87_v21 }
 0x1e7   :  { %v89_v22 = vpop.xlane.xlu1 %88  ;;  %v75_v23 = vpop.xlane.xlu0 %74 }
 0x1e8   :  { %v90_v24 = vrot.slane %v89_v22, 4  ;;  %v76_v25 = vrot.slane %v75_v23, 4 }
 0x1ea   :  { %v91_v26 = vadd.f32 %v90_v24, %v89_v22  ;;  %v77_v27 = vadd.f32 %v76_v25, %v75_v23 }
 0x1ec   :  { %v92_v28 = vrot.slane %v91_v26, 2  ;;  %v78_v29 = vrot.slane %v77_v27, 2 }
 0x1ee   :  { %v93_v30 = vadd.f32 %v92_v28, %v91_v26  ;;  %v79_v31 = vadd.f32 %v78_v29, %v77_v27 }
 0x1f0   :  { %v80_v32 = vrot.slane %v79_v31, 1  ;;  %v94_v33 = vrot.slane %v93_v30, 1 }
 0x1f2   :  { %v81_v34 = vadd.f32 %v80_v32, %v79_v31  ;;  %v95_v35 = vadd.f32 %v94_v33, %v93_v30 }
 0x1f4   :  { %132 = vpush %v81_v34 }
 0x1f5   :  { %134 = vpush %v95_v35 }
 0x225   :  { %s133_s1 = spop %132 }
 0x226   :  { %s135_s4 = spop %134  ;;  %s106_s6 = smul.f32 0.125, %s133_s1 }
 0x227   :  { %s110_s5 = smul.f32 0.0078125, %s135_s4 }
 0x229   :  { %s111_s7 = smul.f32 0.5, %s110_s5 }
 0x22b   :  { %s112_s8 = sadd.f32 %s111_s7, %s106_s6 }
 0x22d   :  { %114 = sst [smem:[#allocation8]] %s112_s8 }
 0x22e   :  { %194 = shalt.err (!%p191_p4)
}
 0x22f   :  { %s203_s16 = smov [#allocation8]  }
 0x230   :  { %122 = dma.smem_to_hbm %s203_s16, 16, %s261_s2, [#allocation5]  }
 0x231   :  { %199 = dma.done.wait [#allocation5], 16  }
 0x232   :  { %200 = vsyncadd [#allocation5], 4294967280 }
 0x233   :  { %126 = sfence }
 0x234   :  { %127 = vsyncpa [#allocation4], 1 }
 0x235   :  { %128 = vsyncpa [#allocation7], 1 }
 0x236   :  { %129 = vsyncpa [#allocation5], 1 }

</bundles_post_ra>
